<compile_context>
chip_gen: v5e
topology: v5e:2x2
jax: 0.10.0
libtpu: 0.0.40
codegen_flags: <defaults>
</compile_context>

<pallas_src>
import functools

import numpy as np
import jax
import jax.numpy as jnp
from jax import lax
from jax.experimental import pallas as pl
from jax.experimental.pallas import tpu as pltpu

BN_EPS = 1e-5
_BN_SCALE = float(1.0 / np.sqrt(1.0 + BN_EPS))  # eval-mode BN, running_mean=0, running_var=1


def _round_up(v, m):
    return ((v + m - 1) // m) * m


# ---------------------------------------------------------------------------
# Fused Pallas kernel: tpl EdgeConv + geo EdgeConv + final MLP for one node tile
# ---------------------------------------------------------------------------
def _gcu_fused_kernel(x_ref, xjt_ref, xjg_ref,
                      w1i_t_ref, w1j_t_ref, b1_t_ref, w2_t_ref, b2_t_ref,
                      w1i_g_ref, w1j_g_ref, b1_g_ref, w2_g_ref, b2_g_ref,
                      wf_t_ref, wf_g_ref, bf_ref,
                      out_ref):
    x_i = x_ref[...]                                      # (TILE_N, Cin)

    def branch(xj_ref, w1i, w1j, b1, w2, b2):
        deg = xj_ref.shape[0]                             # static
        # Layer-1 per-node term (x_i contribution + bias): once per node,
        # not once per edge.  BN scale already folded into w*/b*.
        node_term = jnp.dot(x_i, w1i, preferred_element_type=jnp.float32) + b1   # (TILE_N, H)
        h_dim = w2.shape[1]
        acc0 = jnp.zeros((x_i.shape[0], h_dim), jnp.float32)

        def body(k, acc):
            xj = xj_ref[k]                                # (TILE_N, Cin) neighbor feats
            h = jnp.maximum(
                jnp.dot(xj, w1j, preferred_element_type=jnp.float32) + node_term, 0.0)
            m = jnp.maximum(
                jnp.dot(h, w2, preferred_element_type=jnp.float32) + b2, 0.0)
            return jnp.maximum(acc, m)

        # ReLU => messages >= 0 and every node has >=1 (self-loop) edge, so a
        # zero-initialized running max equals the true max aggregation.
        return lax.fori_loop(0, deg, body, acc0, unroll=(deg <= 32))

    agg_t = branch(xjt_ref, w1i_t_ref[...], w1j_t_ref[...], b1_t_ref[...],
                   w2_t_ref[...], b2_t_ref[...])          # (TILE_N, H)
    agg_g = branch(xjg_ref, w1i_g_ref[...], w1j_g_ref[...], b1_g_ref[...],
                   w2_g_ref[...], b2_g_ref[...])          # (TILE_N, H)

    # Final MLP; Wf split by rows so cat([agg_t, agg_g]) @ Wf needs no concat.
    out = (jnp.dot(agg_t, wf_t_ref[...], preferred_element_type=jnp.float32)
           + jnp.dot(agg_g, wf_g_ref[...], preferred_element_type=jnp.float32)
           + bf_ref[...])
    out_ref[...] = jnp.maximum(out, 0.0)


def _gcu_call(x_pad, xjt, xjg, p, tile_n):
    n_pad, cin = x_pad.shape
    deg_t = xjt.shape[0]
    deg_g = xjg.shape[0]
    w1i_t, w1j_t, b1_t, w2_t, b2_t = p["tpl"]
    w1i_g, w1j_g, b1_g, w2_g, b2_g = p["geo"]
    wf_t, wf_g, bf = p["mlp"]
    out_ch = wf_t.shape[1]

    def rep(a):  # weight replicated across the grid; constant block index => stays resident
        nd = a.ndim
        return pl.BlockSpec(a.shape, lambda i, _nd=nd: (0,) * _nd)

    in_specs = [
        pl.BlockSpec((tile_n, cin), lambda i: (i, 0)),            # x_i tile
        pl.BlockSpec((deg_t, tile_n, cin), lambda i: (0, i, 0)),  # tpl neighbors (deg-major)
        pl.BlockSpec((deg_g, tile_n, cin), lambda i: (0, i, 0)),  # geo neighbors (deg-major)
        rep(w1i_t), rep(w1j_t), rep(b1_t), rep(w2_t), rep(b2_t),
        rep(w1i_g), rep(w1j_g), rep(b1_g), rep(w2_g), rep(b2_g),
        rep(wf_t), rep(wf_g), rep(bf),
    ]

    return pl.pallas_call(
        _gcu_fused_kernel,
        out_shape=jax.ShapeDtypeStruct((n_pad, out_ch), jnp.float32),
        grid=(n_pad // tile_n,),
        in_specs=in_specs,
        out_specs=pl.BlockSpec((tile_n, out_ch), lambda i: (i, 0)),
        compiler_params=pltpu.CompilerParams(
            dimension_semantics=("parallel",),       # node tiles are independent (megacore on v7x)
            vmem_limit_bytes=32 * 1024 * 1024,       # safe on v5e/v6e (128 MiB) and v7x (64 MiB)
        ),
    )(x_pad, xjt, xjg,
      w1i_t, w1j_t, b1_t, w2_t, b2_t,
      w1i_g, w1j_g, b1_g, w2_g, b2_g,
      wf_t, wf_g, bf)


# ---------------------------------------------------------------------------
# Parameter init / prep
# ---------------------------------------------------------------------------
def init_gcu_params(key, in_channels, out_channels):
    h = out_channels // 2
    ks = jax.random.split(key, 6)

    def lin(k, fan_in, fan_out):
        bound = 1.0 / np.sqrt(fan_in)
        kw, kb = jax.random.split(k)
        w = jax.random.uniform(kw, (fan_in, fan_out), jnp.float32, -bound, bound)
        b = jax.random.uniform(kb, (1, fan_out), jnp.float32, -bound, bound)
        return w, b

    params = {}
    for name, kk in zip(("tpl", "geo"), (ks[0:2], ks[2:4])):
        w1, b1 = lin(kk[0], 2 * in_channels, h)
        w2, b2 = lin(kk[1], h, h)
        params[name] = (w1, b1, w2, b2)
    wf, bf = lin(ks[4], out_channels, out_channels)
    params["mlp"] = (wf, bf)
    return params


def prepare_params(params, in_channels):
    """Fold eval-mode BN scale into weights/biases; split W1 (x_i / x_j terms)
    and Wf (tpl / geo halves) so the kernel needs no concat and no extra muls."""
    s = jnp.float32(_BN_SCALE)
    out = {}
    for name in ("tpl", "geo"):
        w1, b1, w2, b2 = params[name]
        w1i = (w1[:in_channels] - w1[in_channels:]) * s   # multiplies x_i
        w1j = w1[in_channels:] * s                        # multiplies x_j
        out[name] = (w1i, w1j, b1 * s, w2 * s, b2 * s)
    wf, bf = params["mlp"]
    h = wf.shape[0] // 2
    out["mlp"] = (wf[:h] * s, wf[h:] * s, bf * s)
    return out


# ---------------------------------------------------------------------------
# Host-side edge preprocessing (remove/add self loops + per-node bucketing)
# ---------------------------------------------------------------------------
def build_padded_neighbors(edge_index, num_nodes, num_nodes_padded, deg_round=8):
    """PyG semantics: remove_self_loops + add_self_loops, then bucket incoming
    edges per destination node and pad every node's neighbor list to MAX_DEG
    with duplicates of its own self-loop (max aggregation is idempotent).

    Returns degree-major int32 array of shape (MAX_DEG, num_nodes_padded)."""
    ei = np.asarray(edge_index)
    src, dst = ei[0].astype(np.int64), ei[1].astype(np.int64)
    keep = src != dst
    src, dst = src[keep], dst[keep]
    loops = np.arange(num_nodes, dtype=np.int64)
    src = np.concatenate([src, loops])
    dst = np.concatenate([dst, loops])

    deg = np.bincount(dst, minlength=num_nodes)
    max_deg = _round_up(int(max(int(deg.max()), 1)), deg_round)

    # Default neighbor = the node itself (duplicate self-loop); padded rows
    # (>= num_nodes) also point to themselves (output sliced away).
    nbr = np.tile(np.arange(num_nodes_padded, dtype=np.int32)[:, None], (1, max_deg))
    fill = np.zeros(num_nodes, dtype=np.int64)
    for s_, d_ in zip(src.tolist(), dst.tolist()):
        nbr[d_, fill[d_]] = s_
        fill[d_] += 1
    return np.ascontiguousarray(nbr.T)   # (MAX_DEG, num_nodes_padded)


# ---------------------------------------------------------------------------
# Forward
# ---------------------------------------------------------------------------
@functools.partial(jax.jit, static_argnames=("tile_n",))
def _gcu_device(x_pad, nbr_t, nbr_g, prepped, tile_n):
    # TODO(synk): for very large graphs move this neighbor gather in-kernel via
    # scalar-prefetched indices / manual DMA instead of an XLA gather.
    xjt = jnp.take(x_pad, nbr_t, axis=0)    # (DEG_T, N_pad, Cin)
    xjg = jnp.take(x_pad, nbr_g, axis=0)    # (DEG_G, N_pad, Cin)
    return _gcu_call(x_pad, xjt, xjg, prepped, tile_n)


def gcu_forward(x, tpl_edge_index, geo_edge_index, params, tile_n=128):
    n, cin = x.shape
    tile_n = int(min(tile_n, _round_up(n, 8)))   # multiple of 8, capped
    n_pad = _round_up(n, tile_n)

    nbr_t = build_padded_neighbors(tpl_edge_index, n, n_pad)
    nbr_g = build_padded_neighbors(geo_edge_index, n, n_pad)
    prepped = prepare_params(params, cin)

    x_pad = jnp.zeros((n_pad, cin), jnp.float32).at[:n].set(x.astype(jnp.float32))
    out = _gcu_device(x_pad, jnp.asarray(nbr_t), jnp.asarray(nbr_g), prepped, tile_n)
    return out[:n]


# ---------------------------------------------------------------------------
# Pure-JAX reference (raw params, unfused) for correctness check
# ---------------------------------------------------------------------------
def preprocess_edges(edge_index_np, num_nodes):
    src, dst = np.asarray(edge_index_np[0]), np.asarray(edge_index_np[1])
    keep = src != dst
    src, dst = src[keep], dst[keep]
    loops = np.arange(num_nodes)
    src = np.concatenate([src, loops]).astype(np.int32)
    dst = np.concatenate([dst, loops]).astype(np.int32)
    return src, dst


def _ref_branch(x, src, dst, params):
    n = x.shape[0]
    w1, b1, w2, b2 = params
    x_i, x_j = x[dst], x[src]
    ef = jnp.concatenate([x_i, x_j - x_i], axis=1)
    h = jnp.maximum(ef @ w1 + b1, 0.0) * _BN_SCALE
    msg = jnp.maximum(h @ w2 + b2, 0.0) * _BN_SCALE
    return jax.ops.segment_max(msg, jnp.asarray(dst), num_segments=n)


def gcu_reference(x, tpl_edge_index, geo_edge_index, params):
    n = x.shape[0]
    src_t, dst_t = preprocess_edges(tpl_edge_index, n)
    src_g, dst_g = preprocess_edges(geo_edge_index, n)
    x_tpl = _ref_branch(x, src_t, dst_t, params["tpl"])
    x_geo = _ref_branch(x, src_g, dst_g, params["geo"])
    x_out = jnp.concatenate([x_tpl, x_geo], axis=1)
    wf, bf = params["mlp"]
    return jnp.maximum(x_out @ wf + bf, 0.0) * _BN_SCALE


# ---------------------------------------------------------------------------
if __name__ == "__main__":
    N, IN_CH, OUT_CH, E = 8, 3, 32, 20

    key = jax.random.PRNGKey(0)
    kx, ke1, ke2, kp = jax.random.split(key, 4)

    x = jax.random.normal(kx, (N, IN_CH), dtype=jnp.float32)
    tpl_edge_index = np.array(jax.random.randint(ke1, (2, E), 0, N), dtype=np.int32)
    geo_edge_index = np.array(jax.random.randint(ke2, (2, E), 0, N), dtype=np.int32)

    params = init_gcu_params(kp, IN_CH, OUT_CH)

    out = jax.block_until_ready(gcu_forward(x, tpl_edge_index, geo_edge_index, params))
    ref = jax.block_until_ready(gcu_reference(x, tpl_edge_index, geo_edge_index, params))

    np.testing.assert_allclose(np.asarray(out), np.asarray(ref), rtol=1e-4, atol=1e-5)
    assert out.shape == (N, OUT_CH)
    print("KERNEL_OK")
</pallas_src>

<mosaic_0001>
module attributes {stable_mosaic.version = 11 : i64} {
  func.func @_gcu_fused_kernel(%arg0: i32, %arg1: memref<8x3xf32, #tpu.memory_space<vmem>>, %arg2: memref<8x8x3xf32, #tpu.memory_space<vmem>>, %arg3: memref<8x8x3xf32, #tpu.memory_space<vmem>>, %arg4: memref<3x16xf32, #tpu.memory_space<vmem>>, %arg5: memref<3x16xf32, #tpu.memory_space<vmem>>, %arg6: memref<1x16xf32, #tpu.memory_space<vmem>>, %arg7: memref<16x16xf32, #tpu.memory_space<vmem>>, %arg8: memref<1x16xf32, #tpu.memory_space<vmem>>, %arg9: memref<3x16xf32, #tpu.memory_space<vmem>>, %arg10: memref<3x16xf32, #tpu.memory_space<vmem>>, %arg11: memref<1x16xf32, #tpu.memory_space<vmem>>, %arg12: memref<16x16xf32, #tpu.memory_space<vmem>>, %arg13: memref<1x16xf32, #tpu.memory_space<vmem>>, %arg14: memref<16x32xf32, #tpu.memory_space<vmem>>, %arg15: memref<16x32xf32, #tpu.memory_space<vmem>>, %arg16: memref<1x32xf32, #tpu.memory_space<vmem>>, %arg17: memref<8x32xf32, #tpu.memory_space<vmem>>) attributes {dimension_semantics = [#tpu.dimension_semantics<parallel>], iteration_bounds = array<i64: 1>, scalar_prefetch = 0 : i64, scratch_operands = 0 : i64, tpu.core_type = #tpu.core_type<tc>, window_params = [{transform_indices = @transform_0, window_bounds = array<i64: 8, 3>}, {transform_indices = @transform_1, window_bounds = array<i64: 8, 8, 3>}, {transform_indices = @transform_2, window_bounds = array<i64: 8, 8, 3>}, {pipeline_mode = #tpu.pipeline_mode<synchronous>, transform_indices = @transform_3, window_bounds = array<i64: 3, 16>}, {pipeline_mode = #tpu.pipeline_mode<synchronous>, transform_indices = @transform_4, window_bounds = array<i64: 3, 16>}, {pipeline_mode = #tpu.pipeline_mode<synchronous>, transform_indices = @transform_5, window_bounds = array<i64: 1, 16>}, {pipeline_mode = #tpu.pipeline_mode<synchronous>, transform_indices = @transform_6, window_bounds = array<i64: 16, 16>}, {pipeline_mode = #tpu.pipeline_mode<synchronous>, transform_indices = @transform_7, window_bounds = array<i64: 1, 16>}, {pipeline_mode = #tpu.pipeline_mode<synchronous>, transform_indices = @transform_8, window_bounds = array<i64: 3, 16>}, {pipeline_mode = #tpu.pipeline_mode<synchronous>, transform_indices = @transform_9, window_bounds = array<i64: 3, 16>}, {pipeline_mode = #tpu.pipeline_mode<synchronous>, transform_indices = @transform_10, window_bounds = array<i64: 1, 16>}, {pipeline_mode = #tpu.pipeline_mode<synchronous>, transform_indices = @transform_11, window_bounds = array<i64: 16, 16>}, {pipeline_mode = #tpu.pipeline_mode<synchronous>, transform_indices = @transform_12, window_bounds = array<i64: 1, 16>}, {pipeline_mode = #tpu.pipeline_mode<synchronous>, transform_indices = @transform_13, window_bounds = array<i64: 16, 32>}, {pipeline_mode = #tpu.pipeline_mode<synchronous>, transform_indices = @transform_14, window_bounds = array<i64: 16, 32>}, {pipeline_mode = #tpu.pipeline_mode<synchronous>, transform_indices = @transform_15, window_bounds = array<i64: 1, 32>}, {transform_indices = @transform_16, window_bounds = array<i64: 8, 32>}]} {
    %c0 = arith.constant 0 : index
    %c0_0 = arith.constant 0 : index
    %0 = vector.load %arg1[%c0, %c0_0] : memref<8x3xf32, #tpu.memory_space<vmem>>, vector<8x3xf32>
    %c0_1 = arith.constant 0 : index
    %c0_2 = arith.constant 0 : index
    %1 = vector.load %arg4[%c0_1, %c0_2] : memref<3x16xf32, #tpu.memory_space<vmem>>, vector<3x16xf32>
    %c0_3 = arith.constant 0 : index
    %c0_4 = arith.constant 0 : index
    %2 = vector.load %arg5[%c0_3, %c0_4] : memref<3x16xf32, #tpu.memory_space<vmem>>, vector<3x16xf32>
    %c0_5 = arith.constant 0 : index
    %c0_6 = arith.constant 0 : index
    %3 = vector.load %arg6[%c0_5, %c0_6] : memref<1x16xf32, #tpu.memory_space<vmem>>, vector<1x16xf32>
    %c0_7 = arith.constant 0 : index
    %c0_8 = arith.constant 0 : index
    %4 = vector.load %arg7[%c0_7, %c0_8] : memref<16x16xf32, #tpu.memory_space<vmem>>, vector<16x16xf32>
    %c0_9 = arith.constant 0 : index
    %c0_10 = arith.constant 0 : index
    %5 = vector.load %arg8[%c0_9, %c0_10] : memref<1x16xf32, #tpu.memory_space<vmem>>, vector<1x16xf32>
    %cst = arith.constant dense<0.000000e+00> : vector<8x16xf32>
    %6 = tpu.matmul %0, %1, %cst {dimension_numbers = #tpu.dot_dimension_numbers<[1], [0], [0], [1], [0, 0, 1, 1], [], []>} : vector<8x3xf32>, vector<3x16xf32>, vector<8x16xf32> -> vector<8x16xf32>
    %7 = vector.broadcast %3 : vector<1x16xf32> to vector<8x16xf32>
    %8 = arith.addf %6, %7 : vector<8x16xf32>
    %cst_11 = arith.constant 0.000000e+00 : f32
    %9 = vector.broadcast %cst_11 : f32 to vector<8x16xf32>
    %c0_i32 = arith.constant 0 : i32
    %10 = arith.index_cast %c0_i32 : i32 to index
    %c0_12 = arith.constant 0 : index
    %c0_13 = arith.constant 0 : index
    %11 = vector.load %arg2[%10, %c0_12, %c0_13] : memref<8x8x3xf32, #tpu.memory_space<vmem>>, vector<1x8x3xf32>
    %12 = vector.shape_cast %11 : vector<1x8x3xf32> to vector<8x3xf32>
    %cst_14 = arith.constant dense<0.000000e+00> : vector<8x16xf32>
    %13 = tpu.matmul %12, %2, %cst_14 {dimension_numbers = #tpu.dot_dimension_numbers<[1], [0], [0], [1], [0, 0, 1, 1], [], []>} : vector<8x3xf32>, vector<3x16xf32>, vector<8x16xf32> -> vector<8x16xf32>
    %14 = arith.addf %13, %8 : vector<8x16xf32>
    %cst_15 = arith.constant 0.000000e+00 : f32
    %15 = vector.broadcast %cst_15 : f32 to vector<8x16xf32>
    %16 = arith.maximumf %14, %15 : vector<8x16xf32>
    %cst_16 = arith.constant dense<0.000000e+00> : vector<8x16xf32>
    %17 = tpu.matmul %16, %4, %cst_16 {dimension_numbers = #tpu.dot_dimension_numbers<[1], [0], [0], [1], [0, 0, 1, 1], [], []>} : vector<8x16xf32>, vector<16x16xf32>, vector<8x16xf32> -> vector<8x16xf32>
    %18 = vector.broadcast %5 : vector<1x16xf32> to vector<8x16xf32>
    %19 = arith.addf %17, %18 : vector<8x16xf32>
    %cst_17 = arith.constant 0.000000e+00 : f32
    %20 = vector.broadcast %cst_17 : f32 to vector<8x16xf32>
    %21 = arith.maximumf %19, %20 : vector<8x16xf32>
    %22 = arith.maximumf %9, %21 : vector<8x16xf32>
    %c1_i32 = arith.constant 1 : i32
    %23 = arith.index_cast %c1_i32 : i32 to index
    %c0_18 = arith.constant 0 : index
    %c0_19 = arith.constant 0 : index
    %24 = vector.load %arg2[%23, %c0_18, %c0_19] : memref<8x8x3xf32, #tpu.memory_space<vmem>>, vector<1x8x3xf32>
    %25 = vector.shape_cast %24 : vector<1x8x3xf32> to vector<8x3xf32>
    %cst_20 = arith.constant dense<0.000000e+00> : vector<8x16xf32>
    %26 = tpu.matmul %25, %2, %cst_20 {dimension_numbers = #tpu.dot_dimension_numbers<[1], [0], [0], [1], [0, 0, 1, 1], [], []>} : vector<8x3xf32>, vector<3x16xf32>, vector<8x16xf32> -> vector<8x16xf32>
    %27 = arith.addf %26, %8 : vector<8x16xf32>
    %cst_21 = arith.constant 0.000000e+00 : f32
    %28 = vector.broadcast %cst_21 : f32 to vector<8x16xf32>
    %29 = arith.maximumf %27, %28 : vector<8x16xf32>
    %cst_22 = arith.constant dense<0.000000e+00> : vector<8x16xf32>
    %30 = tpu.matmul %29, %4, %cst_22 {dimension_numbers = #tpu.dot_dimension_numbers<[1], [0], [0], [1], [0, 0, 1, 1], [], []>} : vector<8x16xf32>, vector<16x16xf32>, vector<8x16xf32> -> vector<8x16xf32>
    %31 = vector.broadcast %5 : vector<1x16xf32> to vector<8x16xf32>
    %32 = arith.addf %30, %31 : vector<8x16xf32>
    %cst_23 = arith.constant 0.000000e+00 : f32
    %33 = vector.broadcast %cst_23 : f32 to vector<8x16xf32>
    %34 = arith.maximumf %32, %33 : vector<8x16xf32>
    %35 = arith.maximumf %22, %34 : vector<8x16xf32>
    %c2_i32 = arith.constant 2 : i32
    %36 = arith.index_cast %c2_i32 : i32 to index
    %c0_24 = arith.constant 0 : index
    %c0_25 = arith.constant 0 : index
    %37 = vector.load %arg2[%36, %c0_24, %c0_25] : memref<8x8x3xf32, #tpu.memory_space<vmem>>, vector<1x8x3xf32>
    %38 = vector.shape_cast %37 : vector<1x8x3xf32> to vector<8x3xf32>
    %cst_26 = arith.constant dense<0.000000e+00> : vector<8x16xf32>
    %39 = tpu.matmul %38, %2, %cst_26 {dimension_numbers = #tpu.dot_dimension_numbers<[1], [0], [0], [1], [0, 0, 1, 1], [], []>} : vector<8x3xf32>, vector<3x16xf32>, vector<8x16xf32> -> vector<8x16xf32>
    %40 = arith.addf %39, %8 : vector<8x16xf32>
    %cst_27 = arith.constant 0.000000e+00 : f32
    %41 = vector.broadcast %cst_27 : f32 to vector<8x16xf32>
    %42 = arith.maximumf %40, %41 : vector<8x16xf32>
    %cst_28 = arith.constant dense<0.000000e+00> : vector<8x16xf32>
    %43 = tpu.matmul %42, %4, %cst_28 {dimension_numbers = #tpu.dot_dimension_numbers<[1], [0], [0], [1], [0, 0, 1, 1], [], []>} : vector<8x16xf32>, vector<16x16xf32>, vector<8x16xf32> -> vector<8x16xf32>
    %44 = vector.broadcast %5 : vector<1x16xf32> to vector<8x16xf32>
    %45 = arith.addf %43, %44 : vector<8x16xf32>
    %cst_29 = arith.constant 0.000000e+00 : f32
    %46 = vector.broadcast %cst_29 : f32 to vector<8x16xf32>
    %47 = arith.maximumf %45, %46 : vector<8x16xf32>
    %48 = arith.maximumf %35, %47 : vector<8x16xf32>
    %c3_i32 = arith.constant 3 : i32
    %49 = arith.index_cast %c3_i32 : i32 to index
    %c0_30 = arith.constant 0 : index
    %c0_31 = arith.constant 0 : index
    %50 = vector.load %arg2[%49, %c0_30, %c0_31] : memref<8x8x3xf32, #tpu.memory_space<vmem>>, vector<1x8x3xf32>
    %51 = vector.shape_cast %50 : vector<1x8x3xf32> to vector<8x3xf32>
    %cst_32 = arith.constant dense<0.000000e+00> : vector<8x16xf32>
    %52 = tpu.matmul %51, %2, %cst_32 {dimension_numbers = #tpu.dot_dimension_numbers<[1], [0], [0], [1], [0, 0, 1, 1], [], []>} : vector<8x3xf32>, vector<3x16xf32>, vector<8x16xf32> -> vector<8x16xf32>
    %53 = arith.addf %52, %8 : vector<8x16xf32>
    %cst_33 = arith.constant 0.000000e+00 : f32
    %54 = vector.broadcast %cst_33 : f32 to vector<8x16xf32>
    %55 = arith.maximumf %53, %54 : vector<8x16xf32>
    %cst_34 = arith.constant dense<0.000000e+00> : vector<8x16xf32>
    %56 = tpu.matmul %55, %4, %cst_34 {dimension_numbers = #tpu.dot_dimension_numbers<[1], [0], [0], [1], [0, 0, 1, 1], [], []>} : vector<8x16xf32>, vector<16x16xf32>, vector<8x16xf32> -> vector<8x16xf32>
    %57 = vector.broadcast %5 : vector<1x16xf32> to vector<8x16xf32>
    %58 = arith.addf %56, %57 : vector<8x16xf32>
    %cst_35 = arith.constant 0.000000e+00 : f32
    %59 = vector.broadcast %cst_35 : f32 to vector<8x16xf32>
    %60 = arith.maximumf %58, %59 : vector<8x16xf32>
    %61 = arith.maximumf %48, %60 : vector<8x16xf32>
    %c4_i32 = arith.constant 4 : i32
    %62 = arith.index_cast %c4_i32 : i32 to index
    %c0_36 = arith.constant 0 : index
    %c0_37 = arith.constant 0 : index
    %63 = vector.load %arg2[%62, %c0_36, %c0_37] : memref<8x8x3xf32, #tpu.memory_space<vmem>>, vector<1x8x3xf32>
    %64 = vector.shape_cast %63 : vector<1x8x3xf32> to vector<8x3xf32>
    %cst_38 = arith.constant dense<0.000000e+00> : vector<8x16xf32>
    %65 = tpu.matmul %64, %2, %cst_38 {dimension_numbers = #tpu.dot_dimension_numbers<[1], [0], [0], [1], [0, 0, 1, 1], [], []>} : vector<8x3xf32>, vector<3x16xf32>, vector<8x16xf32> -> vector<8x16xf32>
    %66 = arith.addf %65, %8 : vector<8x16xf32>
    %cst_39 = arith.constant 0.000000e+00 : f32
    %67 = vector.broadcast %cst_39 : f32 to vector<8x16xf32>
    %68 = arith.maximumf %66, %67 : vector<8x16xf32>
    %cst_40 = arith.constant dense<0.000000e+00> : vector<8x16xf32>
    %69 = tpu.matmul %68, %4, %cst_40 {dimension_numbers = #tpu.dot_dimension_numbers<[1], [0], [0], [1], [0, 0, 1, 1], [], []>} : vector<8x16xf32>, vector<16x16xf32>, vector<8x16xf32> -> vector<8x16xf32>
    %70 = vector.broadcast %5 : vector<1x16xf32> to vector<8x16xf32>
    %71 = arith.addf %69, %70 : vector<8x16xf32>
    %cst_41 = arith.constant 0.000000e+00 : f32
    %72 = vector.broadcast %cst_41 : f32 to vector<8x16xf32>
    %73 = arith.maximumf %71, %72 : vector<8x16xf32>
    %74 = arith.maximumf %61, %73 : vector<8x16xf32>
    %c5_i32 = arith.constant 5 : i32
    %75 = arith.index_cast %c5_i32 : i32 to index
    %c0_42 = arith.constant 0 : index
    %c0_43 = arith.constant 0 : index
    %76 = vector.load %arg2[%75, %c0_42, %c0_43] : memref<8x8x3xf32, #tpu.memory_space<vmem>>, vector<1x8x3xf32>
    %77 = vector.shape_cast %76 : vector<1x8x3xf32> to vector<8x3xf32>
    %cst_44 = arith.constant dense<0.000000e+00> : vector<8x16xf32>
    %78 = tpu.matmul %77, %2, %cst_44 {dimension_numbers = #tpu.dot_dimension_numbers<[1], [0], [0], [1], [0, 0, 1, 1], [], []>} : vector<8x3xf32>, vector<3x16xf32>, vector<8x16xf32> -> vector<8x16xf32>
    %79 = arith.addf %78, %8 : vector<8x16xf32>
    %cst_45 = arith.constant 0.000000e+00 : f32
    %80 = vector.broadcast %cst_45 : f32 to vector<8x16xf32>
    %81 = arith.maximumf %79, %80 : vector<8x16xf32>
    %cst_46 = arith.constant dense<0.000000e+00> : vector<8x16xf32>
    %82 = tpu.matmul %81, %4, %cst_46 {dimension_numbers = #tpu.dot_dimension_numbers<[1], [0], [0], [1], [0, 0, 1, 1], [], []>} : vector<8x16xf32>, vector<16x16xf32>, vector<8x16xf32> -> vector<8x16xf32>
    %83 = vector.broadcast %5 : vector<1x16xf32> to vector<8x16xf32>
    %84 = arith.addf %82, %83 : vector<8x16xf32>
    %cst_47 = arith.constant 0.000000e+00 : f32
    %85 = vector.broadcast %cst_47 : f32 to vector<8x16xf32>
    %86 = arith.maximumf %84, %85 : vector<8x16xf32>
    %87 = arith.maximumf %74, %86 : vector<8x16xf32>
    %c6_i32 = arith.constant 6 : i32
    %88 = arith.index_cast %c6_i32 : i32 to index
    %c0_48 = arith.constant 0 : index
    %c0_49 = arith.constant 0 : index
    %89 = vector.load %arg2[%88, %c0_48, %c0_49] : memref<8x8x3xf32, #tpu.memory_space<vmem>>, vector<1x8x3xf32>
    %90 = vector.shape_cast %89 : vector<1x8x3xf32> to vector<8x3xf32>
    %cst_50 = arith.constant dense<0.000000e+00> : vector<8x16xf32>
    %91 = tpu.matmul %90, %2, %cst_50 {dimension_numbers = #tpu.dot_dimension_numbers<[1], [0], [0], [1], [0, 0, 1, 1], [], []>} : vector<8x3xf32>, vector<3x16xf32>, vector<8x16xf32> -> vector<8x16xf32>
    %92 = arith.addf %91, %8 : vector<8x16xf32>
    %cst_51 = arith.constant 0.000000e+00 : f32
    %93 = vector.broadcast %cst_51 : f32 to vector<8x16xf32>
    %94 = arith.maximumf %92, %93 : vector<8x16xf32>
    %cst_52 = arith.constant dense<0.000000e+00> : vector<8x16xf32>
    %95 = tpu.matmul %94, %4, %cst_52 {dimension_numbers = #tpu.dot_dimension_numbers<[1], [0], [0], [1], [0, 0, 1, 1], [], []>} : vector<8x16xf32>, vector<16x16xf32>, vector<8x16xf32> -> vector<8x16xf32>
    %96 = vector.broadcast %5 : vector<1x16xf32> to vector<8x16xf32>
    %97 = arith.addf %95, %96 : vector<8x16xf32>
    %cst_53 = arith.constant 0.000000e+00 : f32
    %98 = vector.broadcast %cst_53 : f32 to vector<8x16xf32>
    %99 = arith.maximumf %97, %98 : vector<8x16xf32>
    %100 = arith.maximumf %87, %99 : vector<8x16xf32>
    %c7_i32 = arith.constant 7 : i32
    %101 = arith.index_cast %c7_i32 : i32 to index
    %c0_54 = arith.constant 0 : index
    %c0_55 = arith.constant 0 : index
    %102 = vector.load %arg2[%101, %c0_54, %c0_55] : memref<8x8x3xf32, #tpu.memory_space<vmem>>, vector<1x8x3xf32>
    %103 = vector.shape_cast %102 : vector<1x8x3xf32> to vector<8x3xf32>
    %cst_56 = arith.constant dense<0.000000e+00> : vector<8x16xf32>
    %104 = tpu.matmul %103, %2, %cst_56 {dimension_numbers = #tpu.dot_dimension_numbers<[1], [0], [0], [1], [0, 0, 1, 1], [], []>} : vector<8x3xf32>, vector<3x16xf32>, vector<8x16xf32> -> vector<8x16xf32>
    %105 = arith.addf %104, %8 : vector<8x16xf32>
    %cst_57 = arith.constant 0.000000e+00 : f32
    %106 = vector.broadcast %cst_57 : f32 to vector<8x16xf32>
    %107 = arith.maximumf %105, %106 : vector<8x16xf32>
    %cst_58 = arith.constant dense<0.000000e+00> : vector<8x16xf32>
    %108 = tpu.matmul %107, %4, %cst_58 {dimension_numbers = #tpu.dot_dimension_numbers<[1], [0], [0], [1], [0, 0, 1, 1], [], []>} : vector<8x16xf32>, vector<16x16xf32>, vector<8x16xf32> -> vector<8x16xf32>
    %109 = vector.broadcast %5 : vector<1x16xf32> to vector<8x16xf32>
    %110 = arith.addf %108, %109 : vector<8x16xf32>
    %cst_59 = arith.constant 0.000000e+00 : f32
    %111 = vector.broadcast %cst_59 : f32 to vector<8x16xf32>
    %112 = arith.maximumf %110, %111 : vector<8x16xf32>
    %113 = arith.maximumf %100, %112 : vector<8x16xf32>
    %c8_i32 = arith.constant 8 : i32
    %c0_60 = arith.constant 0 : index
    %c0_61 = arith.constant 0 : index
    %114 = vector.load %arg9[%c0_60, %c0_61] : memref<3x16xf32, #tpu.memory_space<vmem>>, vector<3x16xf32>
    %c0_62 = arith.constant 0 : index
    %c0_63 = arith.constant 0 : index
    %115 = vector.load %arg10[%c0_62, %c0_63] : memref<3x16xf32, #tpu.memory_space<vmem>>, vector<3x16xf32>
    %c0_64 = arith.constant 0 : index
    %c0_65 = arith.constant 0 : index
    %116 = vector.load %arg11[%c0_64, %c0_65] : memref<1x16xf32, #tpu.memory_space<vmem>>, vector<1x16xf32>
    %c0_66 = arith.constant 0 : index
    %c0_67 = arith.constant 0 : index
    %117 = vector.load %arg12[%c0_66, %c0_67] : memref<16x16xf32, #tpu.memory_space<vmem>>, vector<16x16xf32>
    %c0_68 = arith.constant 0 : index
    %c0_69 = arith.constant 0 : index
    %118 = vector.load %arg13[%c0_68, %c0_69] : memref<1x16xf32, #tpu.memory_space<vmem>>, vector<1x16xf32>
    %cst_70 = arith.constant dense<0.000000e+00> : vector<8x16xf32>
    %119 = tpu.matmul %0, %114, %cst_70 {dimension_numbers = #tpu.dot_dimension_numbers<[1], [0], [0], [1], [0, 0, 1, 1], [], []>} : vector<8x3xf32>, vector<3x16xf32>, vector<8x16xf32> -> vector<8x16xf32>
    %120 = vector.broadcast %116 : vector<1x16xf32> to vector<8x16xf32>
    %121 = arith.addf %119, %120 : vector<8x16xf32>
    %cst_71 = arith.constant 0.000000e+00 : f32
    %122 = vector.broadcast %cst_71 : f32 to vector<8x16xf32>
    %c0_i32_72 = arith.constant 0 : i32
    %123 = arith.index_cast %c0_i32_72 : i32 to index
    %c0_73 = arith.constant 0 : index
    %c0_74 = arith.constant 0 : index
    %124 = vector.load %arg3[%123, %c0_73, %c0_74] : memref<8x8x3xf32, #tpu.memory_space<vmem>>, vector<1x8x3xf32>
    %125 = vector.shape_cast %124 : vector<1x8x3xf32> to vector<8x3xf32>
    %cst_75 = arith.constant dense<0.000000e+00> : vector<8x16xf32>
    %126 = tpu.matmul %125, %115, %cst_75 {dimension_numbers = #tpu.dot_dimension_numbers<[1], [0], [0], [1], [0, 0, 1, 1], [], []>} : vector<8x3xf32>, vector<3x16xf32>, vector<8x16xf32> -> vector<8x16xf32>
    %127 = arith.addf %126, %121 : vector<8x16xf32>
    %cst_76 = arith.constant 0.000000e+00 : f32
    %128 = vector.broadcast %cst_76 : f32 to vector<8x16xf32>
    %129 = arith.maximumf %127, %128 : vector<8x16xf32>
    %cst_77 = arith.constant dense<0.000000e+00> : vector<8x16xf32>
    %130 = tpu.matmul %129, %117, %cst_77 {dimension_numbers = #tpu.dot_dimension_numbers<[1], [0], [0], [1], [0, 0, 1, 1], [], []>} : vector<8x16xf32>, vector<16x16xf32>, vector<8x16xf32> -> vector<8x16xf32>
    %131 = vector.broadcast %118 : vector<1x16xf32> to vector<8x16xf32>
    %132 = arith.addf %130, %131 : vector<8x16xf32>
    %cst_78 = arith.constant 0.000000e+00 : f32
    %133 = vector.broadcast %cst_78 : f32 to vector<8x16xf32>
    %134 = arith.maximumf %132, %133 : vector<8x16xf32>
    %135 = arith.maximumf %122, %134 : vector<8x16xf32>
    %c1_i32_79 = arith.constant 1 : i32
    %136 = arith.index_cast %c1_i32_79 : i32 to index
    %c0_80 = arith.constant 0 : index
    %c0_81 = arith.constant 0 : index
    %137 = vector.load %arg3[%136, %c0_80, %c0_81] : memref<8x8x3xf32, #tpu.memory_space<vmem>>, vector<1x8x3xf32>
    %138 = vector.shape_cast %137 : vector<1x8x3xf32> to vector<8x3xf32>
    %cst_82 = arith.constant dense<0.000000e+00> : vector<8x16xf32>
    %139 = tpu.matmul %138, %115, %cst_82 {dimension_numbers = #tpu.dot_dimension_numbers<[1], [0], [0], [1], [0, 0, 1, 1], [], []>} : vector<8x3xf32>, vector<3x16xf32>, vector<8x16xf32> -> vector<8x16xf32>
    %140 = arith.addf %139, %121 : vector<8x16xf32>
    %cst_83 = arith.constant 0.000000e+00 : f32
    %141 = vector.broadcast %cst_83 : f32 to vector<8x16xf32>
    %142 = arith.maximumf %140, %141 : vector<8x16xf32>
    %cst_84 = arith.constant dense<0.000000e+00> : vector<8x16xf32>
    %143 = tpu.matmul %142, %117, %cst_84 {dimension_numbers = #tpu.dot_dimension_numbers<[1], [0], [0], [1], [0, 0, 1, 1], [], []>} : vector<8x16xf32>, vector<16x16xf32>, vector<8x16xf32> -> vector<8x16xf32>
    %144 = vector.broadcast %118 : vector<1x16xf32> to vector<8x16xf32>
    %145 = arith.addf %143, %144 : vector<8x16xf32>
    %cst_85 = arith.constant 0.000000e+00 : f32
    %146 = vector.broadcast %cst_85 : f32 to vector<8x16xf32>
    %147 = arith.maximumf %145, %146 : vector<8x16xf32>
    %148 = arith.maximumf %135, %147 : vector<8x16xf32>
    %c2_i32_86 = arith.constant 2 : i32
    %149 = arith.index_cast %c2_i32_86 : i32 to index
    %c0_87 = arith.constant 0 : index
    %c0_88 = arith.constant 0 : index
    %150 = vector.load %arg3[%149, %c0_87, %c0_88] : memref<8x8x3xf32, #tpu.memory_space<vmem>>, vector<1x8x3xf32>
    %151 = vector.shape_cast %150 : vector<1x8x3xf32> to vector<8x3xf32>
    %cst_89 = arith.constant dense<0.000000e+00> : vector<8x16xf32>
    %152 = tpu.matmul %151, %115, %cst_89 {dimension_numbers = #tpu.dot_dimension_numbers<[1], [0], [0], [1], [0, 0, 1, 1], [], []>} : vector<8x3xf32>, vector<3x16xf32>, vector<8x16xf32> -> vector<8x16xf32>
    %153 = arith.addf %152, %121 : vector<8x16xf32>
    %cst_90 = arith.constant 0.000000e+00 : f32
    %154 = vector.broadcast %cst_90 : f32 to vector<8x16xf32>
    %155 = arith.maximumf %153, %154 : vector<8x16xf32>
    %cst_91 = arith.constant dense<0.000000e+00> : vector<8x16xf32>
    %156 = tpu.matmul %155, %117, %cst_91 {dimension_numbers = #tpu.dot_dimension_numbers<[1], [0], [0], [1], [0, 0, 1, 1], [], []>} : vector<8x16xf32>, vector<16x16xf32>, vector<8x16xf32> -> vector<8x16xf32>
    %157 = vector.broadcast %118 : vector<1x16xf32> to vector<8x16xf32>
    %158 = arith.addf %156, %157 : vector<8x16xf32>
    %cst_92 = arith.constant 0.000000e+00 : f32
    %159 = vector.broadcast %cst_92 : f32 to vector<8x16xf32>
    %160 = arith.maximumf %158, %159 : vector<8x16xf32>
    %161 = arith.maximumf %148, %160 : vector<8x16xf32>
    %c3_i32_93 = arith.constant 3 : i32
    %162 = arith.index_cast %c3_i32_93 : i32 to index
    %c0_94 = arith.constant 0 : index
    %c0_95 = arith.constant 0 : index
    %163 = vector.load %arg3[%162, %c0_94, %c0_95] : memref<8x8x3xf32, #tpu.memory_space<vmem>>, vector<1x8x3xf32>
    %164 = vector.shape_cast %163 : vector<1x8x3xf32> to vector<8x3xf32>
    %cst_96 = arith.constant dense<0.000000e+00> : vector<8x16xf32>
    %165 = tpu.matmul %164, %115, %cst_96 {dimension_numbers = #tpu.dot_dimension_numbers<[1], [0], [0], [1], [0, 0, 1, 1], [], []>} : vector<8x3xf32>, vector<3x16xf32>, vector<8x16xf32> -> vector<8x16xf32>
    %166 = arith.addf %165, %121 : vector<8x16xf32>
    %cst_97 = arith.constant 0.000000e+00 : f32
    %167 = vector.broadcast %cst_97 : f32 to vector<8x16xf32>
    %168 = arith.maximumf %166, %167 : vector<8x16xf32>
    %cst_98 = arith.constant dense<0.000000e+00> : vector<8x16xf32>
    %169 = tpu.matmul %168, %117, %cst_98 {dimension_numbers = #tpu.dot_dimension_numbers<[1], [0], [0], [1], [0, 0, 1, 1], [], []>} : vector<8x16xf32>, vector<16x16xf32>, vector<8x16xf32> -> vector<8x16xf32>
    %170 = vector.broadcast %118 : vector<1x16xf32> to vector<8x16xf32>
    %171 = arith.addf %169, %170 : vector<8x16xf32>
    %cst_99 = arith.constant 0.000000e+00 : f32
    %172 = vector.broadcast %cst_99 : f32 to vector<8x16xf32>
    %173 = arith.maximumf %171, %172 : vector<8x16xf32>
    %174 = arith.maximumf %161, %173 : vector<8x16xf32>
    %c4_i32_100 = arith.constant 4 : i32
    %175 = arith.index_cast %c4_i32_100 : i32 to index
    %c0_101 = arith.constant 0 : index
    %c0_102 = arith.constant 0 : index
    %176 = vector.load %arg3[%175, %c0_101, %c0_102] : memref<8x8x3xf32, #tpu.memory_space<vmem>>, vector<1x8x3xf32>
    %177 = vector.shape_cast %176 : vector<1x8x3xf32> to vector<8x3xf32>
    %cst_103 = arith.constant dense<0.000000e+00> : vector<8x16xf32>
    %178 = tpu.matmul %177, %115, %cst_103 {dimension_numbers = #tpu.dot_dimension_numbers<[1], [0], [0], [1], [0, 0, 1, 1], [], []>} : vector<8x3xf32>, vector<3x16xf32>, vector<8x16xf32> -> vector<8x16xf32>
    %179 = arith.addf %178, %121 : vector<8x16xf32>
    %cst_104 = arith.constant 0.000000e+00 : f32
    %180 = vector.broadcast %cst_104 : f32 to vector<8x16xf32>
    %181 = arith.maximumf %179, %180 : vector<8x16xf32>
    %cst_105 = arith.constant dense<0.000000e+00> : vector<8x16xf32>
    %182 = tpu.matmul %181, %117, %cst_105 {dimension_numbers = #tpu.dot_dimension_numbers<[1], [0], [0], [1], [0, 0, 1, 1], [], []>} : vector<8x16xf32>, vector<16x16xf32>, vector<8x16xf32> -> vector<8x16xf32>
    %183 = vector.broadcast %118 : vector<1x16xf32> to vector<8x16xf32>
    %184 = arith.addf %182, %183 : vector<8x16xf32>
    %cst_106 = arith.constant 0.000000e+00 : f32
    %185 = vector.broadcast %cst_106 : f32 to vector<8x16xf32>
    %186 = arith.maximumf %184, %185 : vector<8x16xf32>
    %187 = arith.maximumf %174, %186 : vector<8x16xf32>
    %c5_i32_107 = arith.constant 5 : i32
    %188 = arith.index_cast %c5_i32_107 : i32 to index
    %c0_108 = arith.constant 0 : index
    %c0_109 = arith.constant 0 : index
    %189 = vector.load %arg3[%188, %c0_108, %c0_109] : memref<8x8x3xf32, #tpu.memory_space<vmem>>, vector<1x8x3xf32>
    %190 = vector.shape_cast %189 : vector<1x8x3xf32> to vector<8x3xf32>
    %cst_110 = arith.constant dense<0.000000e+00> : vector<8x16xf32>
    %191 = tpu.matmul %190, %115, %cst_110 {dimension_numbers = #tpu.dot_dimension_numbers<[1], [0], [0], [1], [0, 0, 1, 1], [], []>} : vector<8x3xf32>, vector<3x16xf32>, vector<8x16xf32> -> vector<8x16xf32>
    %192 = arith.addf %191, %121 : vector<8x16xf32>
    %cst_111 = arith.constant 0.000000e+00 : f32
    %193 = vector.broadcast %cst_111 : f32 to vector<8x16xf32>
    %194 = arith.maximumf %192, %193 : vector<8x16xf32>
    %cst_112 = arith.constant dense<0.000000e+00> : vector<8x16xf32>
    %195 = tpu.matmul %194, %117, %cst_112 {dimension_numbers = #tpu.dot_dimension_numbers<[1], [0], [0], [1], [0, 0, 1, 1], [], []>} : vector<8x16xf32>, vector<16x16xf32>, vector<8x16xf32> -> vector<8x16xf32>
    %196 = vector.broadcast %118 : vector<1x16xf32> to vector<8x16xf32>
    %197 = arith.addf %195, %196 : vector<8x16xf32>
    %cst_113 = arith.constant 0.000000e+00 : f32
    %198 = vector.broadcast %cst_113 : f32 to vector<8x16xf32>
    %199 = arith.maximumf %197, %198 : vector<8x16xf32>
    %200 = arith.maximumf %187, %199 : vector<8x16xf32>
    %c6_i32_114 = arith.constant 6 : i32
    %201 = arith.index_cast %c6_i32_114 : i32 to index
    %c0_115 = arith.constant 0 : index
    %c0_116 = arith.constant 0 : index
    %202 = vector.load %arg3[%201, %c0_115, %c0_116] : memref<8x8x3xf32, #tpu.memory_space<vmem>>, vector<1x8x3xf32>
    %203 = vector.shape_cast %202 : vector<1x8x3xf32> to vector<8x3xf32>
    %cst_117 = arith.constant dense<0.000000e+00> : vector<8x16xf32>
    %204 = tpu.matmul %203, %115, %cst_117 {dimension_numbers = #tpu.dot_dimension_numbers<[1], [0], [0], [1], [0, 0, 1, 1], [], []>} : vector<8x3xf32>, vector<3x16xf32>, vector<8x16xf32> -> vector<8x16xf32>
    %205 = arith.addf %204, %121 : vector<8x16xf32>
    %cst_118 = arith.constant 0.000000e+00 : f32
    %206 = vector.broadcast %cst_118 : f32 to vector<8x16xf32>
    %207 = arith.maximumf %205, %206 : vector<8x16xf32>
    %cst_119 = arith.constant dense<0.000000e+00> : vector<8x16xf32>
    %208 = tpu.matmul %207, %117, %cst_119 {dimension_numbers = #tpu.dot_dimension_numbers<[1], [0], [0], [1], [0, 0, 1, 1], [], []>} : vector<8x16xf32>, vector<16x16xf32>, vector<8x16xf32> -> vector<8x16xf32>
    %209 = vector.broadcast %118 : vector<1x16xf32> to vector<8x16xf32>
    %210 = arith.addf %208, %209 : vector<8x16xf32>
    %cst_120 = arith.constant 0.000000e+00 : f32
    %211 = vector.broadcast %cst_120 : f32 to vector<8x16xf32>
    %212 = arith.maximumf %210, %211 : vector<8x16xf32>
    %213 = arith.maximumf %200, %212 : vector<8x16xf32>
    %c7_i32_121 = arith.constant 7 : i32
    %214 = arith.index_cast %c7_i32_121 : i32 to index
    %c0_122 = arith.constant 0 : index
    %c0_123 = arith.constant 0 : index
    %215 = vector.load %arg3[%214, %c0_122, %c0_123] : memref<8x8x3xf32, #tpu.memory_space<vmem>>, vector<1x8x3xf32>
    %216 = vector.shape_cast %215 : vector<1x8x3xf32> to vector<8x3xf32>
    %cst_124 = arith.constant dense<0.000000e+00> : vector<8x16xf32>
    %217 = tpu.matmul %216, %115, %cst_124 {dimension_numbers = #tpu.dot_dimension_numbers<[1], [0], [0], [1], [0, 0, 1, 1], [], []>} : vector<8x3xf32>, vector<3x16xf32>, vector<8x16xf32> -> vector<8x16xf32>
    %218 = arith.addf %217, %121 : vector<8x16xf32>
    %cst_125 = arith.constant 0.000000e+00 : f32
    %219 = vector.broadcast %cst_125 : f32 to vector<8x16xf32>
    %220 = arith.maximumf %218, %219 : vector<8x16xf32>
    %cst_126 = arith.constant dense<0.000000e+00> : vector<8x16xf32>
    %221 = tpu.matmul %220, %117, %cst_126 {dimension_numbers = #tpu.dot_dimension_numbers<[1], [0], [0], [1], [0, 0, 1, 1], [], []>} : vector<8x16xf32>, vector<16x16xf32>, vector<8x16xf32> -> vector<8x16xf32>
    %222 = vector.broadcast %118 : vector<1x16xf32> to vector<8x16xf32>
    %223 = arith.addf %221, %222 : vector<8x16xf32>
    %cst_127 = arith.constant 0.000000e+00 : f32
    %224 = vector.broadcast %cst_127 : f32 to vector<8x16xf32>
    %225 = arith.maximumf %223, %224 : vector<8x16xf32>
    %226 = arith.maximumf %213, %225 : vector<8x16xf32>
    %c8_i32_128 = arith.constant 8 : i32
    %c0_129 = arith.constant 0 : index
    %c0_130 = arith.constant 0 : index
    %227 = vector.load %arg14[%c0_129, %c0_130] : memref<16x32xf32, #tpu.memory_space<vmem>>, vector<16x32xf32>
    %cst_131 = arith.constant dense<0.000000e+00> : vector<8x32xf32>
    %228 = tpu.matmul %113, %227, %cst_131 {dimension_numbers = #tpu.dot_dimension_numbers<[1], [0], [0], [1], [0, 0, 1, 1], [], []>} : vector<8x16xf32>, vector<16x32xf32>, vector<8x32xf32> -> vector<8x32xf32>
    %c0_132 = arith.constant 0 : index
    %c0_133 = arith.constant 0 : index
    %229 = vector.load %arg15[%c0_132, %c0_133] : memref<16x32xf32, #tpu.memory_space<vmem>>, vector<16x32xf32>
    %cst_134 = arith.constant dense<0.000000e+00> : vector<8x32xf32>
    %230 = tpu.matmul %226, %229, %cst_134 {dimension_numbers = #tpu.dot_dimension_numbers<[1], [0], [0], [1], [0, 0, 1, 1], [], []>} : vector<8x16xf32>, vector<16x32xf32>, vector<8x32xf32> -> vector<8x32xf32>
    %231 = arith.addf %228, %230 : vector<8x32xf32>
    %c0_135 = arith.constant 0 : index
    %c0_136 = arith.constant 0 : index
    %232 = vector.load %arg16[%c0_135, %c0_136] : memref<1x32xf32, #tpu.memory_space<vmem>>, vector<1x32xf32>
    %233 = vector.broadcast %232 : vector<1x32xf32> to vector<8x32xf32>
    %234 = arith.addf %231, %233 : vector<8x32xf32>
    %cst_137 = arith.constant 0.000000e+00 : f32
    %235 = vector.broadcast %cst_137 : f32 to vector<8x32xf32>
    %236 = arith.maximumf %234, %235 : vector<8x32xf32>
    %c0_138 = arith.constant 0 : index
    %c0_139 = arith.constant 0 : index
    %237 = vector.load %arg17[%c0_138, %c0_139] : memref<8x32xf32, #tpu.memory_space<vmem>>, vector<8x32xf32>
    tpu.vector_store %arg17[%c0_138, %c0_139], %236 {strides = array<i32>} : memref<8x32xf32, #tpu.memory_space<vmem>>, vector<8x32xf32>,
    return
  }
  func.func @transform_0(%arg0: i32) -> (i32, i32) {
    %c0_i32 = arith.constant 0 : i32
    %c0_i32_0 = arith.constant 0 : i32
    return %arg0, %c0_i32 : i32, i32
  }
  func.func @transform_1(%arg0: i32) -> (i32, i32, i32) {
    %c0_i32 = arith.constant 0 : i32
    %c0_i32_0 = arith.constant 0 : i32
    %c0_i32_1 = arith.constant 0 : i32
    return %c0_i32, %arg0, %c0_i32_0 : i32, i32, i32
  }
  func.func @transform_2(%arg0: i32) -> (i32, i32, i32) {
    %c0_i32 = arith.constant 0 : i32
    %c0_i32_0 = arith.constant 0 : i32
    %c0_i32_1 = arith.constant 0 : i32
    return %c0_i32, %arg0, %c0_i32_0 : i32, i32, i32
  }
  func.func @transform_3(%arg0: i32) -> (i32, i32) {
    %c0_i32 = arith.constant 0 : i32
    %c0_i32_0 = arith.constant 0 : i32
    %c0_i32_1 = arith.constant 0 : i32
    return %c0_i32, %c0_i32_0 : i32, i32
  }
  func.func @transform_4(%arg0: i32) -> (i32, i32) {
    %c0_i32 = arith.constant 0 : i32
    %c0_i32_0 = arith.constant 0 : i32
    %c0_i32_1 = arith.constant 0 : i32
    return %c0_i32, %c0_i32_0 : i32, i32
  }
  func.func @transform_5(%arg0: i32) -> (i32, i32) {
    %c0_i32 = arith.constant 0 : i32
    %c0_i32_0 = arith.constant 0 : i32
    %c0_i32_1 = arith.constant 0 : i32
    return %c0_i32, %c0_i32_0 : i32, i32
  }
  func.func @transform_6(%arg0: i32) -> (i32, i32) {
    %c0_i32 = arith.constant 0 : i32
    %c0_i32_0 = arith.constant 0 : i32
    %c0_i32_1 = arith.constant 0 : i32
    return %c0_i32, %c0_i32_0 : i32, i32
  }
  func.func @transform_7(%arg0: i32) -> (i32, i32) {
    %c0_i32 = arith.constant 0 : i32
    %c0_i32_0 = arith.constant 0 : i32
    %c0_i32_1 = arith.constant 0 : i32
    return %c0_i32, %c0_i32_0 : i32, i32
  }
  func.func @transform_8(%arg0: i32) -> (i32, i32) {
    %c0_i32 = arith.constant 0 : i32
    %c0_i32_0 = arith.constant 0 : i32
    %c0_i32_1 = arith.constant 0 : i32
    return %c0_i32, %c0_i32_0 : i32, i32
  }
  func.func @transform_9(%arg0: i32) -> (i32, i32) {
    %c0_i32 = arith.constant 0 : i32
    %c0_i32_0 = arith.constant 0 : i32
    %c0_i32_1 = arith.constant 0 : i32
    return %c0_i32, %c0_i32_0 : i32, i32
  }
  func.func @transform_10(%arg0: i32) -> (i32, i32) {
    %c0_i32 = arith.constant 0 : i32
    %c0_i32_0 = arith.constant 0 : i32
    %c0_i32_1 = arith.constant 0 : i32
    return %c0_i32, %c0_i32_0 : i32, i32
  }
  func.func @transform_11(%arg0: i32) -> (i32, i32) {
    %c0_i32 = arith.constant 0 : i32
    %c0_i32_0 = arith.constant 0 : i32
    %c0_i32_1 = arith.constant 0 : i32
    return %c0_i32, %c0_i32_0 : i32, i32
  }
  func.func @transform_12(%arg0: i32) -> (i32, i32) {
    %c0_i32 = arith.constant 0 : i32
    %c0_i32_0 = arith.constant 0 : i32
    %c0_i32_1 = arith.constant 0 : i32
    return %c0_i32, %c0_i32_0 : i32, i32
  }
  func.func @transform_13(%arg0: i32) -> (i32, i32) {
    %c0_i32 = arith.constant 0 : i32
    %c0_i32_0 = arith.constant 0 : i32
    %c0_i32_1 = arith.constant 0 : i32
    return %c0_i32, %c0_i32_0 : i32, i32
  }
  func.func @transform_14(%arg0: i32) -> (i32, i32) {
    %c0_i32 = arith.constant 0 : i32
    %c0_i32_0 = arith.constant 0 : i32
    %c0_i32_1 = arith.constant 0 : i32
    return %c0_i32, %c0_i32_0 : i32, i32
  }
  func.func @transform_15(%arg0: i32) -> (i32, i32) {
    %c0_i32 = arith.constant 0 : i32
    %c0_i32_0 = arith.constant 0 : i32
    %c0_i32_1 = arith.constant 0 : i32
    return %c0_i32, %c0_i32_0 : i32, i32
  }
  func.func @transform_16(%arg0: i32) -> (i32, i32) {
    %c0_i32 = arith.constant 0 : i32
    %c0_i32_0 = arith.constant 0 : i32
    return %arg0, %c0_i32 : i32, i32
  }
}

</mosaic_0001>

<bundles_post_ra>
// kernel: _gcu_device.1
= control target key start
LH: loop header
LB: loop body
LE: loop exit
PB: predicated region body
PF: predicated region fallthrough
CT: control target
= control target key end

     0   :  { %s1453_s0 = inlined_call_operand.vmem [shape: f32[8,3], index: 0, kind: input, shape index: {}]   ;;  %s1454_s1 = inlined_call_operand.vmem [shape: f32[8,8,3], index: 1, kind: input, shape index: {}]   ;;  %s1455_s2 = inlined_call_operand.vmem [shape: f32[8,8,3], index: 2, kind: input, shape index: {}]   ;;  %s1456_s3 = inlined_call_operand.vmem [shape: f32[3,16], index: 3, kind: input, shape index: {}]   ;;  %s1457_s4 = inlined_call_operand.vmem [shape: f32[3,16], index: 4, kind: input, shape index: {}]   ;;  %s1458_s5 = inlined_call_operand.vmem [shape: f32[1,16], index: 5, kind: input, shape index: {}]   ;;  %s1459_s6 = inlined_call_operand.vmem [shape: f32[16,16], index: 6, kind: input, shape index: {}]   ;;  %s1460_s7 = inlined_call_operand.vmem [shape: f32[1,16], index: 7, kind: input, shape index: {}]   ;;  %s1461_s8 = inlined_call_operand.vmem [shape: f32[3,16], index: 8, kind: input, shape index: {}]   ;;  %s1462_s9 = inlined_call_operand.vmem [shape: f32[3,16], index: 9, kind: input, shape index: {}]   ;;  %s1463_s10 = inlined_call_operand.vmem [shape: f32[1,16], index: 10, kind: input, shape index: {}]   ;;  %s1464_s11 = inlined_call_operand.vmem [shape: f32[16,16], index: 11, kind: input, shape index: {}]   ;;  %s1465_s12 = inlined_call_operand.vmem [shape: f32[1,16], index: 12, kind: input, shape index: {}]   ;;  %s1466_s13 = inlined_call_operand.vmem [shape: f32[16,32], index: 13, kind: input, shape index: {}]   ;;  %s1467_s14 = inlined_call_operand.vmem [shape: f32[16,32], index: 14, kind: input, shape index: {}]   ;;  %s1468_s15 = inlined_call_operand.vmem [shape: f32[1,32], index: 15, kind: input, shape index: {}]   ;;  %s1469_s16 = inlined_call_operand.hbm [shape: f32[8,32], index: 16, kind: output, shape index: {}]  }
   0x1   :  { %1470 = sst [smem:[#allocation5_spill]] %s1453_s0 }
   0x2   :  { %v55_v0 = vld [vmem:[%s1456_s3] sm:$0x7]  ;;  %vm68_vm0 = vcmask 1042432   ;;  %s1471_s27 = sld [smem:[#allocation5_spill]]  ;;  %vm64_vm1 = vcmask 23552   ;;  %v1030_v4 = vld [vmem:[%s1454_s1 + $0x8] sm:$0xff] }
   0x3   :  { %v56_v1 = vld [vmem:[%s1457_s4] sm:$0x7]  ;;  %1025 = vmatpush.msk.msra.mxu0 %vm68_vm0, %v55_v0 }
   0x4   :  { %1027 = vmatpush.msk.msra.mxu1 %vm68_vm0, %v56_v1  ;;  %v92_v3 = vld [vmem:[%s1454_s1] sm:$0xff]  ;;  %1031 = vmatpush.msk.msra.mxu3 %vm68_vm0, %v56_v1 }
   0x5   :  { %1028 = vmatmul.msk.f32.vlgmr.msra.gmra.mxu1 %vm64_vm1, %v92_v3  ;;  %1032 = vmatmul.msk.f32.vlgmr.msra.gmra.mxu3 %vm64_vm1, %v1030_v4 }
   0x6   :  { %1035 = vmatpush.msk.msrb.mxu1 %vm68_vm0, %v56_v1 }
   0x8   :  { %v54_v2 = vld [vmem:[%s1471_s27] sm:$0xff] }
   0x9   :  { %1026 = vmatmul.msk.f32.vlgmr.msra.gmra.mxu0 %vm64_vm1, %v54_v2 }
   0xa   :  { %21 = vsyncpa [#allocation3], 0  ;;  %1043 = vmatpush.msk.msra.mxu1 %vm68_vm0, %v56_v1  ;;  %v1034_v5 = vld [vmem:[%s1454_s1 + $0x10] sm:$0xff]  ;;  %v1042_v6 = vld [vmem:[%s1454_s1 + $0x20] sm:$0xff]  ;;  %vm123_vm2 = vcmask 130048   ;;  %s1125_s22 = smov [#allocation2]  }
   0xb   :  { %v1050_v7 = vld [vmem:[%s1454_s1 + $0x30] sm:$0xff]  ;;  %v1250_v8 = vld [vmem:[%s1459_s6 + $0x8] sm:$0xff]  ;;  %v1256_v9 = vld [vmem:[%s1459_s6] sm:$0xff]  ;;  %s1014_s23 = sshll.u32 %s1125_s22, 4  ;;  %s1016_s6 = sshll.u32 %s1469_s16, 4  ;;  %vm1007_vm3 = vcmask 261120   ;;  %s1015_s23 = int_to_ptr.vmem [resolvable:$true] %s1014_s23  ;;  %s1017_s6 = int_to_ptr.hbm [resolvable:$true] %s1016_s6 }
   0xc   :  { %141 = vmatpush.msra.mxu2 %v1250_v8  ;;  %192 = vmatpush.msrb.mxu0 %v1250_v8  ;;  %v1094_v10 = vld [vmem:[%s1458_s5] ss:$0 sm:$0xff]  ;;  %v1038_v23 = vld [vmem:[%s1454_s1 + $0x18] sm:$0xff]  ;;  %v1046_v27 = vld [vmem:[%s1454_s1 + $0x28] sm:$0xff] }
   0xd   :  { %1036 = vmatmul.msk.f32.vlgmr.msrb.gmra.mxu1 %vm64_vm1, %v1034_v5  ;;  %243 = vmatpush.msrb.mxu3 %v1250_v8  ;;  %v506_v16 = vld [vmem:[%s1461_s8] sm:$0x7]  ;;  %v1054_v32 = vld [vmem:[%s1454_s1 + $0x38] sm:$0xff]  ;;  %v1067_v34 = vld [vmem:[%s1455_s2 + $0x10] sm:$0xff] }
   0xe   :  { %1051 = vmatpush.msk.msrb.mxu1 %vm68_vm0, %v56_v1  ;;  %142 = vmatpush.msra.mxu2 %v1256_v9  ;;  %v1301_v28 = vld [vmem:[%s1462_s9] sm:$0x7]  ;;  %v1083_v36 = vld [vmem:[%s1455_s2 + $0x30] sm:$0xff]  ;;  %v1361_v63 = vld [vmem:[%s1464_s11 + $0x8] sm:$0xff] }
   0xf   :  { %193 = vmatpush.msrb.mxu0 %v1256_v9  ;;  %244 = vmatpush.msrb.mxu3 %v1256_v9  ;;  %v538_v33 = vld [vmem:[%s1455_s2] sm:$0xff]  ;;  %v1063_v4 = vld [vmem:[%s1455_s2 + $0x8] sm:$0xff] }
  0x10   :  { %1039 = vmatpush.msk.msrb.mxu2 %vm68_vm0, %v56_v1  ;;  %v1075_v35 = vld [vmem:[%s1455_s2 + $0x20] sm:$0xff] }
  0x11   :  { %345 = vmatpush.msra.mxu3 %v1250_v8  ;;  %294 = vmatpush.msra.mxu0 %v1250_v8  ;;  %v1338_v37 = vld [vmem:[%s1460_s7] ss:$0 sm:$0xff] }
  0x12   :  { %v1096_v61 = vld [vmem:[%s1463_s10] ss:$0 sm:$0xff] }
  0x13   :  { %346 = vmatpush.msra.mxu3 %v1256_v9  ;;  %295 = vmatpush.msra.mxu0 %v1256_v9  ;;  %v1366_v0 = vld [vmem:[%s1464_s11] sm:$0xff] }
  0x15   :  { %1044 = vmatmul.msk.f32.vlgmr.msra.gmra.mxu1 %vm64_vm1, %v1042_v6  ;;  %v1071_v6 = vld [vmem:[%s1455_s2 + $0x18] sm:$0xff] }
  0x16   :  { %1058 = vmatpush.msk.msra.mxu1 %vm68_vm0, %v506_v16 }
  0x1d   :  { %1052 = vmatmul.msk.f32.vlgmr.msrb.gmra.mxu1 %vm64_vm1, %v1050_v7  ;;  %v1079_v7 = vld [vmem:[%s1455_s2 + $0x28] sm:$0xff] }
  0x1e   :  { %637 = vmatpush.msrb.mxu1 %v1361_v63 }
  0x20   :  { %638 = vmatpush.msrb.mxu1 %v1366_v0 }
  0x25   :  { %1059 = vmatmul.msk.f32.vlgmr.msra.gmra.mxu1 %vm64_vm1, %v54_v2 }
  0x26   :  { %739 = vmatpush.msra.mxu1 %v1361_v63 }
  0x28   :  { %740 = vmatpush.msra.mxu1 %v1366_v0 }
  0x82   :  { %v116_v13 = vpop.f32.mrf.mxu1 }
  0x86   :  { %v89_v11 = vpop.f32.mrf.mxu0 }
  0x87   :  { %v1271_v12 = vadd.f32 %v1094_v10, %v89_v11 }
  0x88   :  { %v171_v17 = vpop.f32.mrf.mxu3 }
  0x89   :  { %v117_v14 = vadd.f32 %v116_v13, %v1271_v12  ;;  %v172_v18 = vadd.f32 %v171_v17, %v1271_v12 }
  0x8a   :  { %v222_v19 = vpop.f32.mrf.mxu1 }
  0x8b   :  { %v119_v15 = vmax.f32 %v117_v14, 0.0  ;;  %v174_v20 = vmax.f32 %v172_v18, 0.0  ;;  %v223_v21 = vadd.f32 %v222_v19, %v1271_v12  ;;  %v952_v18 = vld [vmem:[%s1466_s13 + $0x8] sm:$0xff]  ;;  %v951_v19 = vld [vmem:[%s1466_s13] sm:$0xff] }
  0x8d   :  { %1029 = vmatmul.msk.f32.vlgmr.msra.gmra.mxu2 %vm123_vm2, %v119_v15  ;;  %v225_v22 = vmax.f32 %v223_v21, 0.0  ;;  %1033 = vmatmul.msk.f32.vlgmr.msrb.gmra.mxu0 %vm123_vm2, %v174_v20 }
  0x8e   :  { %1047 = vmatpush.msk.msra.mxu2 %vm68_vm0, %v56_v1  ;;  %396 = vmatpush.msrb.mxu0 %v1250_v8 }
  0x8f   :  { %1037 = vmatmul.msk.f32.vlgmr.msrb.gmra.mxu3 %vm123_vm2, %v225_v22 }
  0x90   :  { %447 = vmatpush.msrb.mxu3 %v1250_v8  ;;  %397 = vmatpush.msrb.mxu0 %v1256_v9 }
  0x92   :  { %v324_v24 = vpop.f32.mrf.mxu1  ;;  %448 = vmatpush.msrb.mxu3 %v1256_v9 }
  0x93   :  { %v325_v25 = vadd.f32 %v324_v24, %v1271_v12 }
  0x95   :  { %1040 = vmatmul.msk.f32.vlgmr.msrb.gmra.mxu2 %vm64_vm1, %v1038_v23  ;;  %v327_v26 = vmax.f32 %v325_v25, 0.0 }
  0x96   :  { %1055 = vmatpush.msk.msrb.mxu2 %vm68_vm0, %v56_v1 }
  0x97   :  { %1045 = vmatmul.msk.f32.vlgmr.msra.gmra.mxu3 %vm123_vm2, %v327_v26 }
  0x98   :  { %1060 = vmatpush.msk.msra.mxu3 %vm68_vm0, %v1301_v28 }
  0x9a   :  { %v426_v29 = vpop.f32.mrf.mxu1 }
  0x9b   :  { %v427_v30 = vadd.f32 %v426_v29, %v1271_v12 }
  0x9d   :  { %1048 = vmatmul.msk.f32.vlgmr.msra.gmra.mxu2 %vm64_vm1, %v1046_v27  ;;  %v429_v31 = vmax.f32 %v427_v30, 0.0 }
  0x9e   :  { %586 = vmatpush.msra.mxu2 %v1361_v63 }
  0x9f   :  { %1053 = vmatmul.msk.f32.vlgmr.msrb.gmra.mxu3 %vm123_vm2, %v429_v31 }
  0xa0   :  { %1068 = vmatpush.msk.msrb.mxu3 %vm68_vm0, %v1301_v28  ;;  %587 = vmatpush.msra.mxu2 %v1366_v0 }
  0xa2   :  { %v535_v62 = vpop.f32.mrf.mxu1 }
  0xa3   :  { %v1371_v1 = vadd.f32 %v1096_v61, %v535_v62 }
  0xa5   :  { %1056 = vmatmul.msk.f32.vlgmr.msrb.gmra.mxu2 %vm64_vm1, %v1054_v32 }
  0xa6   :  { %688 = vmatpush.msrb.mxu2 %v1361_v63 }
  0xa7   :  { %1061 = vmatmul.msk.f32.vlgmr.msra.gmra.mxu3 %vm64_vm1, %v538_v33 }
  0xa8   :  { %1076 = vmatpush.msk.msra.mxu3 %vm68_vm0, %v1301_v28  ;;  %689 = vmatpush.msrb.mxu2 %v1366_v0 }
  0xaf   :  { %1069 = vmatmul.msk.f32.vlgmr.msrb.gmra.mxu3 %vm64_vm1, %v1067_v34 }
  0xb0   :  { %1084 = vmatpush.msk.msrb.mxu3 %vm68_vm0, %v1301_v28 }
  0xb7   :  { %1077 = vmatmul.msk.f32.vlgmr.msra.gmra.mxu3 %vm64_vm1, %v1075_v35 }
  0xbf   :  { %1085 = vmatmul.msk.f32.vlgmr.msrb.gmra.mxu3 %vm64_vm1, %v1083_v36 }
 0x10a   :  { %v195_v39 = vpop.f32.mrf.mxu0 }
 0x10b   :  { %v196_v42 = vadd.f32 %v1338_v37, %v195_v39 }
 0x10d   :  { %v198_v45 = vmax.f32 %v196_v42, 0.0 }
 0x110   :  { %v144_v38 = vpop.f32.mrf.mxu2 }
 0x111   :  { %v145_v40 = vadd.f32 %v1338_v37, %v144_v38 }
 0x112   :  { %v246_v44 = vpop.f32.mrf.mxu3 }
 0x113   :  { %v147_v41 = vmax.f32 %v145_v40, 0.0  ;;  %v247_v46 = vadd.f32 %v1338_v37, %v246_v44 }
 0x115   :  { %v148_v43 = vmax.f32 %v147_v41, 0.0  ;;  %v249_v50 = vmax.f32 %v247_v46, 0.0 }
 0x117   :  { %v199_v49 = vmax.f32 %v148_v43, %v198_v45 }
 0x118   :  { %v273_v47 = vpop.f32.mrf.mxu2 }
 0x119   :  { %v274_v48 = vadd.f32 %v273_v47, %v1271_v12  ;;  %v1344_v52 = vmax.f32 %v199_v49, %v249_v50  ;;  %v954_v50 = vld [vmem:[%s1467_s14 + $0x8] sm:$0xff] }
 0x11a   :  { %v348_v53 = vpop.f32.mrf.mxu3  ;;  %972 = vmatpush.msra.mxu3 %v954_v50 }
 0x11b   :  { %v276_v51 = vmax.f32 %v274_v48, 0.0  ;;  %v349_v21 = vadd.f32 %v1338_v37, %v348_v53  ;;  %v953_v53 = vld [vmem:[%s1467_s14] sm:$0xff] }
 0x11c   :  { %973 = vmatpush.msra.mxu3 %v953_v53 }
 0x11d   :  { %1041 = vmatmul.msk.f32.vlgmr.msra.gmra.mxu0 %vm123_vm2, %v276_v51  ;;  %v351_v24 = vmax.f32 %v349_v21, 0.0  ;;  %v1098_v21 = vld [vmem:[%s1468_s15] ss:$0 sm:$0xff] }
 0x11e   :  { %498 = vmatpush.msra.mxu0 %v1250_v8  ;;  %v1087_v8 = vld [vmem:[%s1455_s2 + $0x38] sm:$0xff] }
 0x120   :  { %v375_v54 = vpop.f32.mrf.mxu2  ;;  %499 = vmatpush.msra.mxu0 %v1256_v9 }
 0x121   :  { %v376_v55 = vadd.f32 %v375_v54, %v1271_v12 }
 0x122   :  { %v450_v57 = vpop.f32.mrf.mxu3 }
 0x123   :  { %v378_v56 = vmax.f32 %v376_v55, 0.0 }
 0x125   :  { %1049 = vmatmul.msk.f32.vlgmr.msrb.gmra.mxu0 %vm123_vm2, %v378_v56 }
 0x126   :  { %1064 = vmatpush.msk.msrb.mxu0 %vm68_vm0, %v1301_v28 }
 0x128   :  { %v477_v58 = vpop.f32.mrf.mxu2 }
 0x129   :  { %v478_v59 = vadd.f32 %v477_v58, %v1271_v12 }
 0x12a   :  { %v562_v2 = vpop.f32.mrf.mxu3 }
 0x12b   :  { %v480_v60 = vmax.f32 %v478_v59, 0.0  ;;  %v563_v3 = vadd.f32 %v562_v2, %v1371_v1 }
 0x12d   :  { %1057 = vmatmul.msk.f32.vlgmr.msra.gmra.mxu0 %vm123_vm2, %v480_v60  ;;  %v565_v5 = vmax.f32 %v563_v3, 0.0 }
 0x12e   :  { %1072 = vmatpush.msk.msra.mxu0 %vm68_vm0, %v1301_v28 }
 0x12f   :  { %1062 = vmatmul.msk.f32.vlgmr.msra.gmra.mxu2 %vm123_vm2, %v565_v5 }
 0x130   :  { %790 = vmatpush.msra.mxu2 %v1361_v63 }
 0x132   :  { %791 = vmatpush.msra.mxu2 %v1366_v0  ;;  %v667_v9 = vpop.f32.mrf.mxu3 }
 0x133   :  { %v668_v10 = vadd.f32 %v667_v9, %v1371_v1 }
 0x135   :  { %1065 = vmatmul.msk.f32.vlgmr.msrb.gmra.mxu0 %vm64_vm1, %v1063_v4  ;;  %v670_v11 = vmax.f32 %v668_v10, 0.0 }
 0x136   :  { %1080 = vmatpush.msk.msrb.mxu0 %vm68_vm0, %v1301_v28 }
 0x137   :  { %1070 = vmatmul.msk.f32.vlgmr.msrb.gmra.mxu2 %vm123_vm2, %v670_v11 }
 0x138   :  { %892 = vmatpush.msrb.mxu2 %v1361_v63 }
 0x13a   :  { %v769_v12 = vpop.f32.mrf.mxu3  ;;  %893 = vmatpush.msrb.mxu2 %v1366_v0 }
 0x13b   :  { %v770_v13 = vadd.f32 %v769_v12, %v1371_v1 }
 0x13d   :  { %1073 = vmatmul.msk.f32.vlgmr.msra.gmra.mxu0 %vm64_vm1, %v1071_v6  ;;  %v772_v14 = vmax.f32 %v770_v13, 0.0 }
 0x13e   :  { %1088 = vmatpush.msk.msra.mxu0 %vm68_vm0, %v1301_v28  ;;  %v451_v28 = vadd.f32 %v1338_v37, %v450_v57 }
 0x13f   :  { %1078 = vmatmul.msk.f32.vlgmr.msra.gmra.mxu2 %vm123_vm2, %v772_v14 }
 0x140   :  { %995 = vmatpush.msra.mxu2 %v952_v18  ;;  %v453_v31 = vmax.f32 %v451_v28, 0.0 }
 0x142   :  { %v871_v15 = vpop.f32.mrf.mxu3  ;;  %996 = vmatpush.msra.mxu2 %v951_v19 }
 0x143   :  { %v872_v16 = vadd.f32 %v871_v15, %v1371_v1 }
 0x145   :  { %1081 = vmatmul.msk.f32.vlgmr.msrb.gmra.mxu0 %vm64_vm1, %v1079_v7  ;;  %v874_v17 = vmax.f32 %v872_v16, 0.0 }
 0x147   :  { %1086 = vmatmul.msk.f32.vlgmr.msrb.gmra.mxu2 %vm123_vm2, %v874_v17 }
 0x14d   :  { %1089 = vmatmul.msk.f32.vlgmr.msra.gmra.mxu0 %vm64_vm1, %v1087_v8 }
 0x19a   :  { %v297_v20 = vpop.f32.mrf.mxu0 }
 0x19b   :  { %v298_v22 = vadd.f32 %v1338_v37, %v297_v20 }
 0x19d   :  { %v300_v23 = vmax.f32 %v298_v22, 0.0 }
 0x19f   :  { %v301_v25 = vmax.f32 %v1344_v52, %v300_v23  ;;  %v1097_v52 = vld [vmem:[%s1465_s12] ss:$0 sm:$0xff] }
 0x1a1   :  { %v352_v26 = vmax.f32 %v301_v25, %v351_v24 }
 0x1a2   :  { %v399_v27 = vpop.f32.mrf.mxu0 }
 0x1a3   :  { %v400_v29 = vadd.f32 %v1338_v37, %v399_v27 }
 0x1a5   :  { %v402_v30 = vmax.f32 %v400_v29, 0.0 }
 0x1a7   :  { %v403_v32 = vmax.f32 %v352_v26, %v402_v30 }
 0x1a9   :  { %v454_v33 = vmax.f32 %v403_v32, %v453_v31 }
 0x1aa   :  { %v501_v34 = vpop.f32.mrf.mxu0 }
 0x1ab   :  { %v502_v35 = vadd.f32 %v1338_v37, %v501_v34 }
 0x1ad   :  { %v504_v36 = vmax.f32 %v502_v35, 0.0 }
 0x1af   :  { %v505_v38 = vmax.f32 %v454_v33, %v504_v36 }
 0x1b1   :  { %1092 = vmatmul.msk.f32.vlgmr.msra.gmra.mxu2 %vm123_vm2, %v505_v38 }
 0x1b2   :  { %v616_v39 = vpop.f32.mrf.mxu0  ;;  %v589_v51 = vpop.f32.mrf.mxu2 }
 0x1b3   :  { %v617_v40 = vadd.f32 %v616_v39, %v1371_v1  ;;  %v590_v54 = vadd.f32 %v1097_v52, %v589_v51 }
 0x1b5   :  { %v619_v41 = vmax.f32 %v617_v40, 0.0  ;;  %v592_v57 = vmax.f32 %v590_v54, 0.0 }
 0x1b7   :  { %1066 = vmatmul.msk.f32.vlgmr.msrb.gmra.mxu1 %vm123_vm2, %v619_v41  ;;  %v593_v59 = vmax.f32 %v592_v57, 0.0 }
 0x1b8   :  { %841 = vmatpush.msrb.mxu1 %v1361_v63 }
 0x1ba   :  { %v718_v42 = vpop.f32.mrf.mxu0  ;;  %842 = vmatpush.msrb.mxu1 %v1366_v0  ;;  %v691_v55 = vpop.f32.mrf.mxu2 }
 0x1bb   :  { %v719_v43 = vadd.f32 %v718_v42, %v1371_v1  ;;  %v692_v62 = vadd.f32 %v1097_v52, %v691_v55 }
 0x1bd   :  { %v721_v44 = vmax.f32 %v719_v43, 0.0  ;;  %v694_v2 = vmax.f32 %v692_v62, 0.0 }
 0x1bf   :  { %1074 = vmatmul.msk.f32.vlgmr.msra.gmra.mxu1 %vm123_vm2, %v721_v44 }
 0x1c0   :  { %943 = vmatpush.msra.mxu1 %v1361_v63 }
 0x1c2   :  { %v820_v37 = vpop.f32.mrf.mxu0  ;;  %944 = vmatpush.msra.mxu1 %v1366_v0  ;;  %v793_v0 = vpop.f32.mrf.mxu2 }
 0x1c3   :  { %v821_v45 = vadd.f32 %v820_v37, %v1371_v1  ;;  %v794_v4 = vadd.f32 %v1097_v52, %v793_v0 }
 0x1c5   :  { %v823_v46 = vmax.f32 %v821_v45, 0.0  ;;  %v796_v9 = vmax.f32 %v794_v4, 0.0 }
 0x1c7   :  { %1082 = vmatmul.msk.f32.vlgmr.msrb.gmra.mxu1 %vm123_vm2, %v823_v46 }
 0x1ca   :  { %v922_v47 = vpop.f32.mrf.mxu0  ;;  %v895_v11 = vpop.f32.mrf.mxu2 }
 0x1cb   :  { %v923_v48 = vadd.f32 %v922_v47, %v1371_v1  ;;  %v896_v12 = vadd.f32 %v1097_v52, %v895_v11 }
 0x1cd   :  { %v925_v49 = vmax.f32 %v923_v48, 0.0  ;;  %v898_v16 = vmax.f32 %v896_v12, 0.0 }
 0x1cf   :  { %1090 = vmatmul.msk.f32.vlgmr.msra.gmra.mxu1 %vm123_vm2, %v925_v49 }
 0x234   :  { %v640_v56 = vpop.f32.mrf.mxu1  ;;  %v998_v22 = vpop.f32.mrf.mxu2 }
 0x235   :  { %v641_v58 = vadd.f32 %v1097_v52, %v640_v56 }
 0x237   :  { %v643_v60 = vmax.f32 %v641_v58, 0.0 }
 0x239   :  { %v644_v1 = vmax.f32 %v593_v59, %v643_v60 }
 0x23b   :  { %v695_v5 = vmax.f32 %v644_v1, %v694_v2 }
 0x23c   :  { %v742_v61 = vpop.f32.mrf.mxu1 }
 0x23d   :  { %v743_v63 = vadd.f32 %v1097_v52, %v742_v61 }
 0x23f   :  { %v745_v3 = vmax.f32 %v743_v63, 0.0 }
 0x241   :  { %v746_v7 = vmax.f32 %v695_v5, %v745_v3 }
 0x243   :  { %v797_v13 = vmax.f32 %v746_v7, %v796_v9 }
 0x244   :  { %v844_v6 = vpop.f32.mrf.mxu1 }
 0x245   :  { %v845_v8 = vadd.f32 %v1097_v52, %v844_v6 }
 0x247   :  { %v847_v10 = vmax.f32 %v845_v8, 0.0 }
 0x249   :  { %v848_v14 = vmax.f32 %v797_v13, %v847_v10 }
 0x24b   :  { %v899_v18 = vmax.f32 %v848_v14, %v898_v16 }
 0x24c   :  { %v946_v15 = vpop.f32.mrf.mxu1 }
 0x24d   :  { %v947_v17 = vadd.f32 %v1097_v52, %v946_v15 }
 0x24f   :  { %v949_v19 = vmax.f32 %v947_v17, 0.0 }
 0x251   :  { %v950_v20 = vmax.f32 %v899_v18, %v949_v19 }
 0x253   :  { %1091 = vmatmul.msk.f32.vlgmr.msra.gmra.mxu3 %vm123_vm2, %v950_v20 }
 0x2d6   :  { %v975_v23 = vpop.f32.mrf.mxu3 }
 0x2d7   :  { %v999_v24 = vadd.f32 %v998_v22, %v975_v23 }
 0x2d9   :  { %v1005_v25 = vadd.f32 %v1098_v21, %v999_v24 }
 0x2db   :  { %v1006_v26 = vmax.f32 %v1005_v25, 0.0 }
 0x2dd   :  { %1008 = vst.msk [vmem:[#allocation2] sm:$0xff] %vm1007_vm3, %v1006_v26 }
 0x2de   :  { %1019 = dma.vmem_to_hbm [thread:$0]  %s1015_s23, 128, %s1017_s6, [#allocation3]  }
 0x2df   :  { %1123 = dma.done.wait [#allocation3], 128  }
 0x2e0   :  { %1124 = vsyncadd [#allocation3], 4294967168 }
 0x2e1   :  { %1024 = vsyncpa [#allocation3], 1 }

</bundles_post_ra>
